<compile_context>
chip_gen: v7x
topology: tpu7x:2x2x1
jax: 0.10.0
libtpu: 0.0.40
codegen_flags: <defaults>
</compile_context>

<pallas_src>
import functools

import jax
import jax.numpy as jnp
from jax.experimental import pallas as pl
from jax.experimental import pallas as _pl_unused  # noqa: F401
from jax.experimental.pallas import tpu as pltpu


def gat_fused_kernel(x_ref, adj_ref, w_ref, ablk_ref, b_ref, out_ref, *,
                     num_heads, head_dim):
    """All heads in one invocation. Every ref is the full array in VMEM."""
    H, hd = num_heads, head_dim

    x = x_ref[...]          # [N, Fin]
    adj = adj_ref[...]      # [N, N]
    w = w_ref[...]          # [Fin, H*hd]   (head h -> columns h*hd:(h+1)*hd)
    a_blk = ablk_ref[...]   # [H*hd, 2H]    block-diagonal [a_left | a_right]
    b = b_ref[...]          # [1, H*hd]

    # One MXU matmul projects x for every head at once.
    wx_all = jnp.dot(x, w, preferred_element_type=jnp.float32)      # [N, H*hd]

    # One MXU matmul computes a_left.wx and a_right.wx for every head:
    #   scores[:, h]   = el_h,   scores[:, H+h] = er_h
    scores = jnp.dot(wx_all, a_blk, preferred_element_type=jnp.float32)  # [N, 2H]
    el_all = scores[:, :H]                 # [N, H]
    er_all_t = jnp.transpose(scores[:, H:])  # [H, N] -- one transpose for all heads

    mask = adj > 0
    neg_big = jnp.float32(-9e15)

    for h in range(H):                     # static unroll (H is small)
        lo = h * hd
        wx = wx_all[:, lo:lo + hd]                               # [N, hd]

        # e[i, j] = el_h[i] + er_h[j]
        e = el_all[:, h:h + 1] + er_all_t[h:h + 1, :]            # [N, N]
        # leaky_relu(negative_slope=0.2)
        e = jnp.where(e > 0, e, 0.2 * e)

        # Exact reference softmax: masked entries are -9e15 before the exp,
        # so rows with zero neighbors softmax to uniform 1/N (like torch),
        # and denom >= 1 always (reciprocal is safe).
        e_m = jnp.where(mask, e, neg_big)
        m = jnp.max(e_m, axis=-1, keepdims=True)                 # [N, 1]
        p = jnp.exp(e_m - m)                                     # masked -> 0
        denom = jnp.sum(p, axis=-1, keepdims=True)               # [N, 1]
        att = p * pl.reciprocal(denom, approx=True)

        out_h = jnp.dot(att, wx, preferred_element_type=jnp.float32)  # [N, hd]
        # Store straight into the head's lane slice: bias + ReLU fused.
        out_ref[:, lo:lo + hd] = jnp.maximum(out_h + b[:, lo:lo + hd], 0.0)


def pack_gat_params(W, a, bias):
    """One-time packing of nn.Parameter tensors into kernel-friendly layouts.

    W: [H, Fin, hd], a: [H, 2*hd], bias: [H*hd]
    Returns:
      w_all [Fin, H*hd], a_blk [H*hd, 2H] block-diagonal, b2 [1, H*hd].
    """
    H, Fin, hd = W.shape
    w_all = jnp.transpose(W, (1, 0, 2)).reshape(Fin, H * hd).astype(jnp.float32)

    a = a.astype(jnp.float32)
    a_blk = jnp.zeros((H * hd, 2 * H), jnp.float32)
    for h in range(H):
        a_blk = a_blk.at[h * hd:(h + 1) * hd, h].set(a[h, :hd])        # a_left
        a_blk = a_blk.at[h * hd:(h + 1) * hd, H + h].set(a[h, hd:])    # a_right

    b2 = bias.reshape(1, H * hd).astype(jnp.float32)
    return w_all, a_blk, b2


@jax.jit
def gat_forward(x, adj, w_all, a_blk, b2):
    """x: [N, Fin], adj: [N, N], pre-packed w_all/a_blk/b2 from pack_gat_params."""
    N = x.shape[0]
    HD = w_all.shape[1]
    H = a_blk.shape[1] // 2
    hd = HD // H

    kernel = functools.partial(gat_fused_kernel, num_heads=H, head_dim=hd)
    vmem_spec = pl.BlockSpec(memory_space=pltpu.MemorySpace.VMEM)
    return pl.pallas_call(
        kernel,
        out_shape=jax.ShapeDtypeStruct((N, HD), jnp.float32),
        in_specs=[vmem_spec] * 5,
        out_specs=vmem_spec,
    )(x, adj, w_all, a_blk, b2)


def graph_attention_layer_ref(x, adj, W, a, bias):
    """Pure-JAX reference mirroring the PyTorch forward exactly."""
    H, Fin, hd = W.shape
    outs = []
    for i in range(H):
        wx = x @ W[i]                                           # [N, hd]
        e = wx @ a[i, :hd][:, None] + (wx @ a[i, hd:][:, None]).T
        e = jnp.where(e > 0, e, 0.2 * e)
        att = jnp.where(adj > 0, e, jnp.float32(-9e15))
        att = jax.nn.softmax(att, axis=1)
        outs.append(att @ wx)
    out = jnp.concatenate(outs, axis=1) + bias
    return jnp.maximum(out, 0.0)


if __name__ == "__main__":
    # Small, deterministic problem consistent with the module's forward:
    #   x: [N, in_features], adj: [N, N]
    N = 8
    in_features = 16
    out_features = 32
    num_heads = 4
    head_dim = out_features // num_heads

    key = jax.random.PRNGKey(0)
    kx, kadj, kw, ka = jax.random.split(key, 4)

    x = jax.random.normal(kx, (N, in_features), dtype=jnp.float32)

    # Binary adjacency with self-loops; last row is made fully isolated to
    # exercise the zero-neighbor (uniform-softmax) path of the reference.
    adj = (jax.random.uniform(kadj, (N, N)) > 0.5).astype(jnp.float32)
    adj = jnp.maximum(adj, jnp.eye(N, dtype=jnp.float32))
    adj = adj.at[N - 1, :].set(0.0)

    # Deterministic Xavier-uniform style init (same shapes as nn.Parameter defs)
    fan_in_w, fan_out_w = in_features * head_dim, num_heads * head_dim
    lim_w = (6.0 / (fan_in_w + fan_out_w)) ** 0.5
    W = jax.random.uniform(kw, (num_heads, in_features, head_dim),
                           minval=-lim_w, maxval=lim_w, dtype=jnp.float32)

    lim_a = (6.0 / (2 * head_dim + num_heads)) ** 0.5
    a = jax.random.uniform(ka, (num_heads, 2 * head_dim),
                           minval=-lim_a, maxval=lim_a, dtype=jnp.float32)

    bias = jnp.zeros((out_features,), dtype=jnp.float32)  # nn.init.zeros_

    # Pack parameters once (init time), then the per-call path is one jitted
    # pallas_call with no eager prep ops.
    w_all, a_blk, b2 = pack_gat_params(W, a, bias)

    out = gat_forward(x, adj, w_all, a_blk, b2)
    out = jax.block_until_ready(out)

    ref = graph_attention_layer_ref(x, adj, W, a, bias)
    assert out.shape == (N, out_features)
    assert jnp.allclose(out, ref, rtol=2e-3, atol=2e-3), (
        f"max abs err {jnp.max(jnp.abs(out - ref))}")

    print("KERNEL_OK")
</pallas_src>

<mosaic_0001>
module attributes {stable_mosaic.version = 11 : i64} {
  func.func @gat_fused_kernel(%arg0: memref<8x16xf32, #tpu.memory_space<vmem>>, %arg1: memref<8x8xf32, #tpu.memory_space<vmem>>, %arg2: memref<16x32xf32, #tpu.memory_space<vmem>>, %arg3: memref<32x8xf32, #tpu.memory_space<vmem>>, %arg4: memref<1x32xf32, #tpu.memory_space<vmem>>, %arg5: memref<8x32xf32, #tpu.memory_space<vmem>>) attributes {dimension_semantics = [], scalar_prefetch = 0 : i64, scratch_operands = 0 : i64, tpu.core_type = #tpu.core_type<tc>} {
    %c0 = arith.constant 0 : index
    %c0_0 = arith.constant 0 : index
    %0 = vector.load %arg0[%c0, %c0_0] : memref<8x16xf32, #tpu.memory_space<vmem>>, vector<8x16xf32>
    %c0_1 = arith.constant 0 : index
    %c0_2 = arith.constant 0 : index
    %1 = vector.load %arg1[%c0_1, %c0_2] : memref<8x8xf32, #tpu.memory_space<vmem>>, vector<8x8xf32>
    %c0_3 = arith.constant 0 : index
    %c0_4 = arith.constant 0 : index
    %2 = vector.load %arg2[%c0_3, %c0_4] : memref<16x32xf32, #tpu.memory_space<vmem>>, vector<16x32xf32>
    %c0_5 = arith.constant 0 : index
    %c0_6 = arith.constant 0 : index
    %3 = vector.load %arg3[%c0_5, %c0_6] : memref<32x8xf32, #tpu.memory_space<vmem>>, vector<32x8xf32>
    %c0_7 = arith.constant 0 : index
    %c0_8 = arith.constant 0 : index
    %4 = vector.load %arg4[%c0_7, %c0_8] : memref<1x32xf32, #tpu.memory_space<vmem>>, vector<1x32xf32>
    %cst = arith.constant dense<0.000000e+00> : vector<8x32xf32>
    %5 = tpu.matmul %0, %2, %cst {dimension_numbers = #tpu.dot_dimension_numbers<[1], [0], [0], [1], [0, 0, 1, 1], [], []>} : vector<8x16xf32>, vector<16x32xf32>, vector<8x32xf32> -> vector<8x32xf32>
    %cst_9 = arith.constant dense<0.000000e+00> : vector<8x8xf32>
    %6 = tpu.matmul %5, %3, %cst_9 {dimension_numbers = #tpu.dot_dimension_numbers<[1], [0], [0], [1], [0, 0, 1, 1], [], []>} : vector<8x32xf32>, vector<32x8xf32>, vector<8x8xf32> -> vector<8x8xf32>
    %7 = vector.extract_strided_slice %6 {offsets = [0, 0], sizes = [8, 4], strides = [1, 1]} : vector<8x8xf32> to vector<8x4xf32>
    %8 = vector.extract_strided_slice %6 {offsets = [0, 4], sizes = [8, 4], strides = [1, 1]} : vector<8x8xf32> to vector<8x4xf32>
    %9 = tpu.transpose %8, [1, 0] : vector<8x4xf32> -> vector<4x8xf32>
    %cst_10 = arith.constant 0.000000e+00 : f32
    %10 = vector.broadcast %cst_10 : f32 to vector<8x8xf32>
    %11 = arith.cmpf ogt, %1, %10 : vector<8x8xf32>
    %12 = vector.extract_strided_slice %5 {offsets = [0, 0], sizes = [8, 8], strides = [1, 1]} : vector<8x32xf32> to vector<8x8xf32>
    %13 = vector.extract_strided_slice %7 {offsets = [0, 0], sizes = [8, 1], strides = [1, 1]} : vector<8x4xf32> to vector<8x1xf32>
    %14 = vector.extract_strided_slice %9 {offsets = [0, 0], sizes = [1, 8], strides = [1, 1]} : vector<4x8xf32> to vector<1x8xf32>
    %15 = vector.broadcast %13 : vector<8x1xf32> to vector<8x8xf32>
    %16 = vector.broadcast %14 : vector<1x8xf32> to vector<8x8xf32>
    %17 = arith.addf %15, %16 : vector<8x8xf32>
    %cst_11 = arith.constant 0.000000e+00 : f32
    %18 = vector.broadcast %cst_11 : f32 to vector<8x8xf32>
    %19 = arith.cmpf ogt, %17, %18 : vector<8x8xf32>
    %cst_12 = arith.constant 2.000000e-01 : f32
    %20 = vector.broadcast %cst_12 : f32 to vector<8x8xf32>
    %21 = arith.mulf %20, %17 : vector<8x8xf32>
    %22 = arith.select %19, %17, %21 : vector<8x8xi1>, vector<8x8xf32>
    %cst_13 = arith.constant -9.000000e+15 : f32
    %23 = vector.broadcast %cst_13 : f32 to vector<8x8xf32>
    %24 = arith.select %11, %22, %23 : vector<8x8xi1>, vector<8x8xf32>
    %cst_14 = arith.constant dense<0xFF800000> : vector<8xf32>
    %25 = vector.multi_reduction <maximumf>, %24, %cst_14 [1] : vector<8x8xf32> to vector<8xf32>
    %26 = vector.shape_cast %25 : vector<8xf32> to vector<8x1xf32>
    %27 = vector.broadcast %26 : vector<8x1xf32> to vector<8x8xf32>
    %28 = arith.subf %24, %27 : vector<8x8xf32>
    %29 = math.exp %28 : vector<8x8xf32>
    %cst_15 = arith.constant dense<0.000000e+00> : vector<8xf32>
    %30 = vector.multi_reduction <add>, %29, %cst_15 [1] : vector<8x8xf32> to vector<8xf32>
    %31 = vector.shape_cast %30 : vector<8xf32> to vector<8x1xf32>
    %32 = tpu.reciprocal %31 {approx = true} : vector<8x1xf32> -> vector<8x1xf32>
    %33 = vector.broadcast %32 : vector<8x1xf32> to vector<8x8xf32>
    %34 = arith.mulf %29, %33 : vector<8x8xf32>
    %cst_16 = arith.constant dense<0.000000e+00> : vector<8x8xf32>
    %35 = tpu.matmul %34, %12, %cst_16 {dimension_numbers = #tpu.dot_dimension_numbers<[1], [0], [0], [1], [0, 0, 1, 1], [], []>} : vector<8x8xf32>, vector<8x8xf32>, vector<8x8xf32> -> vector<8x8xf32>
    %36 = vector.extract_strided_slice %4 {offsets = [0, 0], sizes = [1, 8], strides = [1, 1]} : vector<1x32xf32> to vector<1x8xf32>
    %37 = vector.broadcast %36 : vector<1x8xf32> to vector<8x8xf32>
    %38 = arith.addf %35, %37 : vector<8x8xf32>
    %cst_17 = arith.constant 0.000000e+00 : f32
    %39 = vector.broadcast %cst_17 : f32 to vector<8x8xf32>
    %40 = arith.maximumf %38, %39 : vector<8x8xf32>
    %c0_18 = arith.constant 0 : index
    %c0_19 = arith.constant 0 : index
    %41 = vector.load %arg5[%c0_18, %c0_19] : memref<8x32xf32, #tpu.memory_space<vmem>>, vector<8x8xf32>
    tpu.vector_store %arg5[%c0_18, %c0_19], %40 {strides = array<i32>} : memref<8x32xf32, #tpu.memory_space<vmem>>, vector<8x8xf32>,
    %42 = vector.extract_strided_slice %5 {offsets = [0, 8], sizes = [8, 8], strides = [1, 1]} : vector<8x32xf32> to vector<8x8xf32>
    %43 = vector.extract_strided_slice %7 {offsets = [0, 1], sizes = [8, 1], strides = [1, 1]} : vector<8x4xf32> to vector<8x1xf32>
    %44 = vector.extract_strided_slice %9 {offsets = [1, 0], sizes = [1, 8], strides = [1, 1]} : vector<4x8xf32> to vector<1x8xf32>
    %45 = vector.broadcast %43 : vector<8x1xf32> to vector<8x8xf32>
    %46 = vector.broadcast %44 : vector<1x8xf32> to vector<8x8xf32>
    %47 = arith.addf %45, %46 : vector<8x8xf32>
    %cst_20 = arith.constant 0.000000e+00 : f32
    %48 = vector.broadcast %cst_20 : f32 to vector<8x8xf32>
    %49 = arith.cmpf ogt, %47, %48 : vector<8x8xf32>
    %cst_21 = arith.constant 2.000000e-01 : f32
    %50 = vector.broadcast %cst_21 : f32 to vector<8x8xf32>
    %51 = arith.mulf %50, %47 : vector<8x8xf32>
    %52 = arith.select %49, %47, %51 : vector<8x8xi1>, vector<8x8xf32>
    %cst_22 = arith.constant -9.000000e+15 : f32
    %53 = vector.broadcast %cst_22 : f32 to vector<8x8xf32>
    %54 = arith.select %11, %52, %53 : vector<8x8xi1>, vector<8x8xf32>
    %cst_23 = arith.constant dense<0xFF800000> : vector<8xf32>
    %55 = vector.multi_reduction <maximumf>, %54, %cst_23 [1] : vector<8x8xf32> to vector<8xf32>
    %56 = vector.shape_cast %55 : vector<8xf32> to vector<8x1xf32>
    %57 = vector.broadcast %56 : vector<8x1xf32> to vector<8x8xf32>
    %58 = arith.subf %54, %57 : vector<8x8xf32>
    %59 = math.exp %58 : vector<8x8xf32>
    %cst_24 = arith.constant dense<0.000000e+00> : vector<8xf32>
    %60 = vector.multi_reduction <add>, %59, %cst_24 [1] : vector<8x8xf32> to vector<8xf32>
    %61 = vector.shape_cast %60 : vector<8xf32> to vector<8x1xf32>
    %62 = tpu.reciprocal %61 {approx = true} : vector<8x1xf32> -> vector<8x1xf32>
    %63 = vector.broadcast %62 : vector<8x1xf32> to vector<8x8xf32>
    %64 = arith.mulf %59, %63 : vector<8x8xf32>
    %cst_25 = arith.constant dense<0.000000e+00> : vector<8x8xf32>
    %65 = tpu.matmul %64, %42, %cst_25 {dimension_numbers = #tpu.dot_dimension_numbers<[1], [0], [0], [1], [0, 0, 1, 1], [], []>} : vector<8x8xf32>, vector<8x8xf32>, vector<8x8xf32> -> vector<8x8xf32>
    %66 = vector.extract_strided_slice %4 {offsets = [0, 8], sizes = [1, 8], strides = [1, 1]} : vector<1x32xf32> to vector<1x8xf32>
    %67 = vector.broadcast %66 : vector<1x8xf32> to vector<8x8xf32>
    %68 = arith.addf %65, %67 : vector<8x8xf32>
    %cst_26 = arith.constant 0.000000e+00 : f32
    %69 = vector.broadcast %cst_26 : f32 to vector<8x8xf32>
    %70 = arith.maximumf %68, %69 : vector<8x8xf32>
    %c0_27 = arith.constant 0 : index
    %c8 = arith.constant 8 : index
    %71 = vector.load %arg5[%c0_27, %c8] : memref<8x32xf32, #tpu.memory_space<vmem>>, vector<8x8xf32>
    tpu.vector_store %arg5[%c0_27, %c8], %70 {strides = array<i32>} : memref<8x32xf32, #tpu.memory_space<vmem>>, vector<8x8xf32>,
    %72 = vector.extract_strided_slice %5 {offsets = [0, 16], sizes = [8, 8], strides = [1, 1]} : vector<8x32xf32> to vector<8x8xf32>
    %73 = vector.extract_strided_slice %7 {offsets = [0, 2], sizes = [8, 1], strides = [1, 1]} : vector<8x4xf32> to vector<8x1xf32>
    %74 = vector.extract_strided_slice %9 {offsets = [2, 0], sizes = [1, 8], strides = [1, 1]} : vector<4x8xf32> to vector<1x8xf32>
    %75 = vector.broadcast %73 : vector<8x1xf32> to vector<8x8xf32>
    %76 = vector.broadcast %74 : vector<1x8xf32> to vector<8x8xf32>
    %77 = arith.addf %75, %76 : vector<8x8xf32>
    %cst_28 = arith.constant 0.000000e+00 : f32
    %78 = vector.broadcast %cst_28 : f32 to vector<8x8xf32>
    %79 = arith.cmpf ogt, %77, %78 : vector<8x8xf32>
    %cst_29 = arith.constant 2.000000e-01 : f32
    %80 = vector.broadcast %cst_29 : f32 to vector<8x8xf32>
    %81 = arith.mulf %80, %77 : vector<8x8xf32>
    %82 = arith.select %79, %77, %81 : vector<8x8xi1>, vector<8x8xf32>
    %cst_30 = arith.constant -9.000000e+15 : f32
    %83 = vector.broadcast %cst_30 : f32 to vector<8x8xf32>
    %84 = arith.select %11, %82, %83 : vector<8x8xi1>, vector<8x8xf32>
    %cst_31 = arith.constant dense<0xFF800000> : vector<8xf32>
    %85 = vector.multi_reduction <maximumf>, %84, %cst_31 [1] : vector<8x8xf32> to vector<8xf32>
    %86 = vector.shape_cast %85 : vector<8xf32> to vector<8x1xf32>
    %87 = vector.broadcast %86 : vector<8x1xf32> to vector<8x8xf32>
    %88 = arith.subf %84, %87 : vector<8x8xf32>
    %89 = math.exp %88 : vector<8x8xf32>
    %cst_32 = arith.constant dense<0.000000e+00> : vector<8xf32>
    %90 = vector.multi_reduction <add>, %89, %cst_32 [1] : vector<8x8xf32> to vector<8xf32>
    %91 = vector.shape_cast %90 : vector<8xf32> to vector<8x1xf32>
    %92 = tpu.reciprocal %91 {approx = true} : vector<8x1xf32> -> vector<8x1xf32>
    %93 = vector.broadcast %92 : vector<8x1xf32> to vector<8x8xf32>
    %94 = arith.mulf %89, %93 : vector<8x8xf32>
    %cst_33 = arith.constant dense<0.000000e+00> : vector<8x8xf32>
    %95 = tpu.matmul %94, %72, %cst_33 {dimension_numbers = #tpu.dot_dimension_numbers<[1], [0], [0], [1], [0, 0, 1, 1], [], []>} : vector<8x8xf32>, vector<8x8xf32>, vector<8x8xf32> -> vector<8x8xf32>
    %96 = vector.extract_strided_slice %4 {offsets = [0, 16], sizes = [1, 8], strides = [1, 1]} : vector<1x32xf32> to vector<1x8xf32>
    %97 = vector.broadcast %96 : vector<1x8xf32> to vector<8x8xf32>
    %98 = arith.addf %95, %97 : vector<8x8xf32>
    %cst_34 = arith.constant 0.000000e+00 : f32
    %99 = vector.broadcast %cst_34 : f32 to vector<8x8xf32>
    %100 = arith.maximumf %98, %99 : vector<8x8xf32>
    %c0_35 = arith.constant 0 : index
    %c16 = arith.constant 16 : index
    %101 = vector.load %arg5[%c0_35, %c16] : memref<8x32xf32, #tpu.memory_space<vmem>>, vector<8x8xf32>
    tpu.vector_store %arg5[%c0_35, %c16], %100 {strides = array<i32>} : memref<8x32xf32, #tpu.memory_space<vmem>>, vector<8x8xf32>,
    %102 = vector.extract_strided_slice %5 {offsets = [0, 24], sizes = [8, 8], strides = [1, 1]} : vector<8x32xf32> to vector<8x8xf32>
    %103 = vector.extract_strided_slice %7 {offsets = [0, 3], sizes = [8, 1], strides = [1, 1]} : vector<8x4xf32> to vector<8x1xf32>
    %104 = vector.extract_strided_slice %9 {offsets = [3, 0], sizes = [1, 8], strides = [1, 1]} : vector<4x8xf32> to vector<1x8xf32>
    %105 = vector.broadcast %103 : vector<8x1xf32> to vector<8x8xf32>
    %106 = vector.broadcast %104 : vector<1x8xf32> to vector<8x8xf32>
    %107 = arith.addf %105, %106 : vector<8x8xf32>
    %cst_36 = arith.constant 0.000000e+00 : f32
    %108 = vector.broadcast %cst_36 : f32 to vector<8x8xf32>
    %109 = arith.cmpf ogt, %107, %108 : vector<8x8xf32>
    %cst_37 = arith.constant 2.000000e-01 : f32
    %110 = vector.broadcast %cst_37 : f32 to vector<8x8xf32>
    %111 = arith.mulf %110, %107 : vector<8x8xf32>
    %112 = arith.select %109, %107, %111 : vector<8x8xi1>, vector<8x8xf32>
    %cst_38 = arith.constant -9.000000e+15 : f32
    %113 = vector.broadcast %cst_38 : f32 to vector<8x8xf32>
    %114 = arith.select %11, %112, %113 : vector<8x8xi1>, vector<8x8xf32>
    %cst_39 = arith.constant dense<0xFF800000> : vector<8xf32>
    %115 = vector.multi_reduction <maximumf>, %114, %cst_39 [1] : vector<8x8xf32> to vector<8xf32>
    %116 = vector.shape_cast %115 : vector<8xf32> to vector<8x1xf32>
    %117 = vector.broadcast %116 : vector<8x1xf32> to vector<8x8xf32>
    %118 = arith.subf %114, %117 : vector<8x8xf32>
    %119 = math.exp %118 : vector<8x8xf32>
    %cst_40 = arith.constant dense<0.000000e+00> : vector<8xf32>
    %120 = vector.multi_reduction <add>, %119, %cst_40 [1] : vector<8x8xf32> to vector<8xf32>
    %121 = vector.shape_cast %120 : vector<8xf32> to vector<8x1xf32>
    %122 = tpu.reciprocal %121 {approx = true} : vector<8x1xf32> -> vector<8x1xf32>
    %123 = vector.broadcast %122 : vector<8x1xf32> to vector<8x8xf32>
    %124 = arith.mulf %119, %123 : vector<8x8xf32>
    %cst_41 = arith.constant dense<0.000000e+00> : vector<8x8xf32>
    %125 = tpu.matmul %124, %102, %cst_41 {dimension_numbers = #tpu.dot_dimension_numbers<[1], [0], [0], [1], [0, 0, 1, 1], [], []>} : vector<8x8xf32>, vector<8x8xf32>, vector<8x8xf32> -> vector<8x8xf32>
    %126 = vector.extract_strided_slice %4 {offsets = [0, 24], sizes = [1, 8], strides = [1, 1]} : vector<1x32xf32> to vector<1x8xf32>
    %127 = vector.broadcast %126 : vector<1x8xf32> to vector<8x8xf32>
    %128 = arith.addf %125, %127 : vector<8x8xf32>
    %cst_42 = arith.constant 0.000000e+00 : f32
    %129 = vector.broadcast %cst_42 : f32 to vector<8x8xf32>
    %130 = arith.maximumf %128, %129 : vector<8x8xf32>
    %c0_43 = arith.constant 0 : index
    %c24 = arith.constant 24 : index
    %131 = vector.load %arg5[%c0_43, %c24] : memref<8x32xf32, #tpu.memory_space<vmem>>, vector<8x8xf32>
    tpu.vector_store %arg5[%c0_43, %c24], %130 {strides = array<i32>} : memref<8x32xf32, #tpu.memory_space<vmem>>, vector<8x8xf32>,
    return
  }
}

</mosaic_0001>

<bundles_post_ra>
// kernel: gat_forward.1
= control target key start
LH: loop header
LB: loop body
LE: loop exit
PB: predicated region body
PF: predicated region fallthrough
CT: control target
= control target key end

     0   :  { %v795_v2 = vmov 0.0|0.0   ;;  %vm796_vm0 = vmmov 0   ;;  %v797_v4 = vmov 0.0   ;;  %s923_s0 = inlined_call_operand.vmem [shape: f32[8,16], index: 0, kind: input, shape index: {}]   ;;  %s924_s1 = inlined_call_operand.vmem [shape: f32[8,8], index: 1, kind: input, shape index: {}]   ;;  %s925_s2 = inlined_call_operand.vmem [shape: f32[16,32], index: 2, kind: input, shape index: {}]   ;;  %s926_s3 = inlined_call_operand.vmem [shape: f32[32,8], index: 3, kind: input, shape index: {}]   ;;  %s927_s4 = inlined_call_operand.vmem [shape: f32[1,32], index: 4, kind: input, shape index: {}]   ;;  %s928_s5 = inlined_call_operand.hbm [shape: f32[8,32], index: 5, kind: output, shape index: {}]  }
   0x1   :  { %v23_v0 = vld [vmem:[%s925_s2] sm:$0xff]  ;;  %v24_v1 = vld [vmem:[%s925_s2 + $0x8] sm:$0xff]  ;;  %726 = vmatprep.subr.bf16.mxu0 %v795_v2  ;;  %692 = vmatprep.mubr.msk.f32.mxu0 %vm796_vm0, %v797_v4  ;;  %v27_v7 = vld [vmem:[%s926_s3 + $0x10] sm:$0xff] }
   0x2   :  { %v727_v3 = vpack.c.bf16 %v24_v1, %v23_v0  ;;  %v25_v5 = vld [vmem:[%s926_s3] sm:$0xff]  ;;  %v26_v6 = vld [vmem:[%s926_s3 + $0x8] sm:$0xff]  ;;  %729 = vmatprep.subr.bf16.mxu1 %v795_v2  ;;  %v28_v9 = vld [vmem:[%s926_s3 + $0x18] sm:$0xff]  ;;  %703 = vmatprep.mubr.msk.f32.mxu1 %vm796_vm0, %v797_v4 }
   0x3   :  { %v730_v8 = vpack.c.bf16 %v26_v6, %v25_v5 }
   0x4   :  { %10 = vsyncpa [#allocation3], 0  ;;  %728 = vmatpush3.bf16.msra.mxu0 %v727_v3  ;;  %v21_v10 = vld [vmem:[%s923_s0] sm:$0xff]  ;;  %vm30_vm1 = vcmask 130048   ;;  %v733_v11 = vpack.c.bf16 %v28_v9, %v27_v7  ;;  %v798_v12 = vmov 1   ;;  %vm104_vm2 = vcmask 261120  }
   0x5   :  { %731 = vmatpush3.bf16.msra.mxu1 %v730_v8  ;;  %706 = vmatprep.subr.mxu0 %v797_v4  ;;  %v799_v15 = vmov 0   ;;  %s800_s0 = smov 124   ;;  %v801_v18 = vmov 2   ;;  %v802_v19 = vmov 3   ;;  %v219_v21 = vlaneseq  ;;  %v22_v35 = vld [vmem:[%s924_s1] sm:$0xff]  ;;  %s803_s1 = smov 112  }
   0x6   :  { %732 = vmatprep.subr.bf16.mxu1 %v795_v2  ;;  %751 = vset.pattern.permute.xlu1 %v798_v12  ;;  %vm214_vm3 = vcmp.gt.f32.partialorder %v22_v35, 0.0  ;;  %vm228_vm6 = vcmask 64512   ;;  %s804_s7 = smov 120   ;;  %s805_s8 = smov 104   ;;  %vm429_vm9 = vcmask 130112   ;;  %vm539_vm10 = vcmask 195712  }
   0x7   :  { %693 = vmatmul.mubr.msk.f32.vlgmr.msra.gmra.mrb[0].mxu0 %vm30_vm1, %v21_v10  ;;  %750 = vset.pattern.permute.xlu0 %v799_v15  ;;  %v220_v23 = vshrl.u32 %v219_v21, 7  ;;  %s807_s11 = smov 16   ;;  %s808_s12 = smov 24   ;;  %vm649_vm11 = vcmask 261312  }
   0x8   :  { %708 = vmatprep.mubr.msk.f32.mxu0 %vm796_vm0, %v797_v4  ;;  %s809_s13 = smov [#allocation2]  }
   0x9   :  { %734 = vmatpush3.bf16.msra.mxu1 %v733_v11  ;;  %v221_v26 = vsub.s32 0, %v220_v23  ;;  %v327_v27 = vsub.s32 1, %v220_v23  ;;  %v437_v28 = vsub.s32 2, %v220_v23  ;;  %v547_v29 = vsub.s32 3, %v220_v23  ;;  %s657_s14 = sshll.u32 %s809_s13, 4  ;;  %s658_s14 = int_to_ptr.vmem [resolvable:$true] %s657_s14 }
   0xa   :  { %716 = vmatprep.subr.mxu1 %v797_v4  ;;  %s771_s15 = scalar_lea.vmem %s658_s14, 128  ;;  %p776_p1 = scmp.lt.s32.totalorder %s658_s14, %s658_s14 }
   0xb   :  { %p772_p0 = scmp.ne.s32.totalorder %s658_s14, %s771_s15  ;;  %p777_p2 = scmp.lt.s32.totalorder %s771_s15, %s771_s15 }
   0xd   :  { %p778_p3 = por %p777_p2, %p776_p1 }
   0xf   :  { %p779_p4 = pnand %p778_p3, %p772_p0 }
  0xda   :  { %v869_v13 = vpop.f32.mrb[0].mxu0 }
  0xdb   :  { %v694_v14 = vpop.f32.mrb[1].mxu0  ;;  %704 = vmatmul.mubr.msk.f32.vlgmr.msra.gmra.mrb[0].mxu1 %vm104_vm2, %v869_v13  ;;  %707 = vmatpush3.msra.mxu0 %v869_v13 }
  0xdc   :  { %711 = vmatprep.subr.mxu0 %v797_v4  ;;  %718 = vmatprep.mubr.msk.f32.mxu1 %vm796_vm0, %v797_v4 }
 0x1ae   :  { %v174_v16 = vpop.f32.mrb[0].mxu1 }
 0x1af   :  { %322 = vperm.xlu1 %751, %v174_v16   ;;  %179 = vrot.lane.b32.xlu0 %v174_v16, %s800_s0  ;;  %v705_v17 = vpop.f32.mrb[1].mxu1 }
 0x1b3   :  { %752 = vset.pattern.permute.xlu1 %v801_v18  ;;  %216 = vperm.xlu0 %750, %v174_v16  }
 0x1b4   :  { %432 = vperm.xlu1 %752, %v174_v16  }
 0x1b8   :  { %753 = vset.pattern.permute.xlu1 %v802_v19 }
 0x1b9   :  { %542 = vperm.xlu1 %753, %v174_v16   ;;  %v667_v16 = vld [vmem:[%s927_s4] ss:$0 sm:$0xff]  ;;  %s806_s4 = smov 8  }
 0x221   :  { %v180_v20 = vpop.permute.xlu0 %179 }
 0x222   :  { %182 = vxpose.xlu0.b32.start.end [1/1] (short) (narrow) %v180_v20, 8 }
 0x22e   :  { %v323_v22 = vpop.permute.xlu1 %322 }
 0x232   :  { %v217_v24 = vpop.permute.xlu0 %216 }
 0x233   :  { %v433_v25 = vpop.permute.xlu1 %432 }
 0x238   :  { %v543_v36 = vpop.permute.xlu1 %542 }
 0x24b   :  { %754 = vset.pattern.permute.xlu0 %v802_v19 }
 0x2a2   :  { %v198_v30 = vpop.trf.xlu0 }
 0x2a3   :  { %v222_v31 = vrot.slane %v198_v30, %v221_v26  ;;  %v328_v32 = vrot.slane %v198_v30, %v327_v27  ;;  %v438_v33 = vrot.slane %v198_v30, %v437_v28  ;;  %v548_v34 = vrot.slane %v198_v30, %v547_v29 }
 0x2a5   :  { %v329_v37 = vadd.f32 %v328_v32, %v323_v22  ;;  %v223_v38 = vadd.f32 %v222_v31, %v217_v24  ;;  %v439_v39 = vadd.f32 %v438_v33, %v433_v25  ;;  %v549_v40 = vadd.f32 %v548_v34, %v543_v36 }
 0x2a7   :  { %vm330_vm4 = vcmp.gt.f32.partialorder %v329_v37, 0.0  ;;  %v331_v41 = vmul.f32 0.2, %v329_v37  ;;  %vm224_vm5 = vcmp.gt.f32.partialorder %v223_v38, 0.0  ;;  %v225_v42 = vmul.f32 0.2, %v223_v38 }
 0x2a8   :  { %vm440_vm7 = vcmp.gt.f32.partialorder %v439_v39, 0.0  ;;  %v441_v43 = vmul.f32 0.2, %v439_v39  ;;  %v551_v46 = vmul.f32 0.2, %v549_v40  ;;  %vm550_vm8 = vcmp.gt.f32.partialorder %v549_v40, 0.0 }
 0x2a9   :  { %v332_v44 = vsel %vm330_vm4, %v329_v37, %v331_v41  ;;  %v226_v45 = vsel %vm224_vm5, %v223_v38, %v225_v42 }
 0x2aa   :  { %v333_v47 = vsel %vm214_vm3, %v332_v44, -9e+15  ;;  %v227_v48 = vsel %vm214_vm3, %v226_v45, -9e+15  ;;  %v442_v49 = vsel %vm440_vm7, %v439_v39, %v441_v43  ;;  %v552_v53 = vsel %vm550_vm8, %v549_v40, %v551_v46 }
 0x2ab   :  { %v334_v50 = vsel %vm228_vm6, %v333_v47, -inf  ;;  %v229_v51 = vsel %vm228_vm6, %v227_v48, -inf  ;;  %v443_v52 = vsel %vm214_vm3, %v442_v49, -9e+15  ;;  %v553_v55 = vsel %vm214_vm3, %v552_v53, -9e+15 }
 0x2ac   :  { %335 = vmax.xlane.f32.xlu0 %v334_v50  ;;  %230 = vmax.xlane.f32.xlu1 %v229_v51  ;;  %v444_v54 = vsel %vm228_vm6, %v443_v52, -inf  ;;  %v554_v56 = vsel %vm228_vm6, %v553_v55, -inf }
 0x2b0   :  { %445 = vmax.xlane.f32.xlu1 %v444_v54 }
 0x2b4   :  { %555 = vmax.xlane.f32.xlu1 %v554_v56 }
 0x2c2   :  { %455 = vrot.lane.b32.xlu0 %v869_v13, %s803_s1 }
 0x2c5   :  { %345 = vrot.lane.b32.xlu1 %v869_v13, %s804_s7 }
 0x339   :  { %v336_v57 = vpop.xlane.xlu0 %335  ;;  %v231_v58 = vpop.xlane.xlu1 %230 }
 0x33a   :  { %v337_v59 = vsub.f32 %v333_v47, %v336_v57  ;;  %v232_v60 = vsub.f32 %v227_v48, %v231_v58 }
 0x33c   :  { %v233_v61 = vmul.f32 1.442695, %v232_v60  ;;  %v338_v62 = vmul.f32 1.442695, %v337_v59 }
 0x33d   :  { %v456_v63 = vpop.permute.xlu0 %455  ;;  %v446_v0 = vpop.xlane.xlu1 %445 }
 0x33e   :  { %v447_v1 = vsub.f32 %v443_v52, %v446_v0  ;;  %717 = vmatpush3.msra.mxu1 %v456_v63  ;;  %755 = vpow2.f32 %v233_v61 }
 0x33f   :  { %757 = vpow2.f32 %v338_v62 }
 0x340   :  { %v448_v2 = vmul.f32 1.442695, %v447_v1 }
 0x341   :  { %v556_v3 = vpop.xlane.xlu1 %555 }
 0x342   :  { %v557_v5 = vsub.f32 %v553_v55, %v556_v3  ;;  %759 = vpow2.f32 %v448_v2 }
 0x344   :  { %v558_v6 = vmul.f32 1.442695, %v557_v5 }
 0x345   :  { %v346_v17 = vpop.permute.xlu1 %345 }
 0x346   :  { %761 = vpow2.f32 %v558_v6 }
 0x348   :  { %v756_v7 = vpop.eup %755 }
 0x349   :  { %v235_v8 = vsel %vm228_vm6, %v756_v7, 0.0  ;;  %v758_v9 = vpop.eup %757 }
 0x34a   :  { %236 = vadd.xlane.f32.xlu1 %v235_v8  ;;  %v340_v10 = vsel %vm228_vm6, %v758_v9, 0.0 }
 0x34c   :  { %v760_v11 = vpop.eup %759 }
 0x34d   :  { %v450_v12 = vsel %vm228_vm6, %v760_v11, 0.0 }
 0x34e   :  { %341 = vadd.xlane.f32.xlu1 %v340_v10 }
 0x350   :  { %v762_v14 = vpop.eup %761 }
 0x351   :  { %v560_v15 = vsel %vm228_vm6, %v762_v14, 0.0 }
 0x352   :  { %451 = vadd.xlane.f32.xlu1 %v450_v12 }
 0x356   :  { %561 = vadd.xlane.f32.xlu1 %v560_v15 }
 0x367   :  { %565 = vrot.lane.b32.xlu1 %v869_v13, %s805_s8 }
 0x36b   :  { %348 = vrot.lane.b32.xlu1 %v667_v16, %s804_s7 }
 0x36f   :  { %458 = vrot.lane.b32.xlu1 %v667_v16, %s803_s1 }
 0x373   :  { %568 = vrot.lane.b32.xlu1 %v667_v16, %s805_s8 }
 0x3d7   :  { %v237_v18 = vpop.xlane.xlu1 %236 }
 0x3d8   :  { %763 = vrcp.f32 %v237_v18 }
 0x3db   :  { %v342_v19 = vpop.xlane.xlu1 %341 }
 0x3dc   :  { %765 = vrcp.f32 %v342_v19 }
 0x3df   :  { %v452_v20 = vpop.xlane.xlu1 %451 }
 0x3e0   :  { %767 = vrcp.f32 %v452_v20 }
 0x3e2   :  { %v764_v21 = vpop.eup %763 }
 0x3e3   :  { %v239_v22 = vmul.f32 %v764_v21, %v756_v7  ;;  %v562_v23 = vpop.xlane.xlu1 %561 }
 0x3e4   :  { %769 = vrcp.f32 %v562_v23 }
 0x3e5   :  { %709 = vmatmul.mubr.msk.f32.vlgmr.msra.gmra.mrb[2].mxu0 %vm228_vm6, %v239_v22 }
 0x3e6   :  { %v766_v13 = vpop.eup %765  ;;  %712 = vmatpush3.msra.mxu0 %v346_v17  ;;  %713 = vmatprep.mubr.msk.f32.mxu0 %vm796_vm0, %v797_v4 }
 0x3e7   :  { %v344_v24 = vmul.f32 %v766_v13, %v758_v9  ;;  %v566_v25 = vpop.permute.xlu1 %565  ;;  %721 = vmatprep.subr.mxu0 %v797_v4 }
 0x3e9   :  { %714 = vmatmul.mubr.msk.f32.vlgmr.msra.gmra.mrb[4].mxu0 %vm228_vm6, %v344_v24 }
 0x3ea   :  { %v768_v26 = vpop.eup %767  ;;  %722 = vmatpush3.msra.mxu0 %v566_v25  ;;  %723 = vmatprep.mubr.msk.f32.mxu0 %vm796_vm0, %v797_v4 }
 0x3eb   :  { %v454_v27 = vmul.f32 %v768_v26, %v760_v11  ;;  %v349_v30 = vpop.permute.xlu1 %348 }
 0x3ed   :  { %719 = vmatmul.mubr.msk.f32.vlgmr.msra.gmra.mrb[2].mxu1 %vm228_vm6, %v454_v27 }
 0x3ee   :  { %v770_v28 = vpop.eup %769 }
 0x3ef   :  { %v564_v29 = vmul.f32 %v770_v28, %v762_v14  ;;  %v459_v36 = vpop.permute.xlu1 %458 }
 0x3f1   :  { %724 = vmatmul.mubr.msk.f32.vlgmr.msra.gmra.mrb[6].mxu0 %vm228_vm6, %v564_v29 }
 0x3f3   :  { %v569_v42 = vpop.permute.xlu1 %568 }
 0x4b8   :  { %v315_v31 = vpop.f32.mrb[2].mxu0 }
 0x4b9   :  { %v316_v32 = vadd.f32 %v667_v16, %v315_v31  ;;  %v710_v33 = vpop.f32.mrb[3].mxu0 }
 0x4bb   :  { %v319_v34 = vmax.f32 %v316_v32, 0.0 }
 0x4bc   :  { %v420_v35 = vpop.f32.mrb[4].mxu0 }
 0x4bd   :  { %320 = vst.msk [vmem:[#allocation2] sm:$0xff] %vm228_vm6, %v319_v34  ;;  %v421_v37 = vadd.f32 %v420_v35, %v349_v30  ;;  %v715_v38 = vpop.f32.mrb[5].mxu0 }
 0x4bf   :  { %v424_v39 = vmax.f32 %v421_v37, 0.0 }
 0x4c0   :  { %v530_v4 = vpop.f32.mrb[2].mxu1 }
 0x4c1   :  { %v531_v40 = vadd.f32 %v530_v4, %v459_v36  ;;  %v720_v41 = vpop.f32.mrb[3].mxu1  ;;  %426 = vrot.lane.b32.xlu1 %v424_v39, %s806_s4 }
 0x4c3   :  { %v534_v43 = vmax.f32 %v531_v40, 0.0 }
 0x4c4   :  { %v640_v44 = vpop.f32.mrb[6].mxu0 }
 0x4c5   :  { %v641_v45 = vadd.f32 %v640_v44, %v569_v42  ;;  %536 = vrot.lane.b32.xlu0 %v534_v43, %s807_s11  ;;  %v725_v46 = vpop.f32.mrb[7].mxu0 }
 0x4c7   :  { %v644_v47 = vmax.f32 %v641_v45, 0.0 }
 0x4c9   :  { %646 = vrot.lane.b32.xlu1 %v644_v47, %s808_s12 }
 0x533   :  { %v427_v48 = vpop.permute.xlu1 %426 }
 0x534   :  { %430 = vst.msk [vmem:[#allocation2] sm:$0xff] %vm429_vm9, %v427_v48 }
 0x537   :  { %v537_v49 = vpop.permute.xlu0 %536 }
 0x538   :  { %540 = vst.msk [vmem:[#allocation2] sm:$0xff] %vm539_vm10, %v537_v49 }
 0x53b   :  { %v647_v50 = vpop.permute.xlu1 %646 }
 0x53c   :  { %650 = vst.msk [vmem:[#allocation2] sm:$0xff] %vm649_vm11, %v647_v50 }
 0x53d   :  { %782 = shalt.err (!%p779_p4)
}
 0x53e   :  { %s783_s18 = scalar_lea.hbm %s928_s5, 128 }
 0x53f   :  { %p784_p5 = scmp.ne.s32.totalorder %s928_s5, %s783_s18  ;;  %p787_p6 = scmp.lt.u32.totalorder %s783_s18, %s928_s5 }
 0x541   :  { %p789_p7 = pnand %p787_p6, %p784_p5 }
 0x543   :  { %792 = shalt.err (!%p789_p7)
}
 0x544   :  { %660 = dma.vmem_to_hbm [thread:$0]  %s658_s14, 128, %s928_s5, [#allocation3]  }
 0x545   :  { %793 = dma.done.wait [#allocation3], 128  }
 0x546   :  { %794 = vsyncadd [#allocation3], 4294967168 }
 0x547   :  { %664 = vsyncpa [#allocation3], 1 }

</bundles_post_ra>
